<compile_context>
chip_gen: v5e
topology: v5e:2x2
jax: 0.10.0
libtpu: 0.0.40
codegen_flags: <defaults>
</compile_context>

<pallas_src>
import jax
import jax.numpy as jnp
from jax.experimental import pallas as pl
from jax.experimental.pallas import tpu as pltpu

_VMEM_LIMIT = 48 * 1024 * 1024


# ----------------------------------------------------------------------------
# Single-step LSTM cell kernel (matches Module.forward semantics exactly).
# ----------------------------------------------------------------------------
def lstm_cell_kernel(xh_ref, c_ref, wu_ref, b_ref, gates_ref, hc_ref):
    n_out = c_ref.shape[-1]

    # One fused MXU matmul: (tm, n_in+n_out) @ (n_in+n_out, 4*n_out)
    z = (jnp.dot(xh_ref[...], wu_ref[...], preferred_element_type=jnp.float32)
         + b_ref[...])

    # Dense activation pass: sigmoid everywhere, tanh on the c~ lane block,
    # selected with a lane-index mask (no cross-lane shuffles).
    lane = jax.lax.broadcasted_iota(jnp.int32, z.shape, 1)
    act = jnp.where(lane >= 3 * n_out, jnp.tanh(z), jax.nn.sigmoid(z))

    # Lane-dense gate slab store: [i | f | o | c~]
    gates_ref[...] = act

    i = act[:, 0 * n_out:1 * n_out]
    f = act[:, 1 * n_out:2 * n_out]
    o = act[:, 2 * n_out:3 * n_out]
    c_bar = act[:, 3 * n_out:4 * n_out]

    c_new = f * c_ref[...] + i * c_bar
    h_new = o * jnp.tanh(c_new)

    # Packed [h | c] slab, single store.
    hc_ref[...] = jnp.concatenate([h_new, c_new], axis=-1)


def lstm_cell(x, h, c, WU, b):
    """One LSTM step. Returns (h_new, c_new, i, f, o) like the torch module."""
    B, n_in = x.shape
    n_out = h.shape[1]
    K = n_in + n_out

    xh = jnp.concatenate([x, h], axis=1)            # (B, n_in + n_out)

    tm = B if B <= 128 else 128                     # batch tile (full B at demo size)
    grid_m = pl.cdiv(B, tm)

    grid_spec = pltpu.PrefetchScalarGridSpec(
        num_scalar_prefetch=0,
        grid=(grid_m,),
        in_specs=[
            pl.BlockSpec((tm, K), lambda m: (m, 0)),             # [x|h] batch tile
            pl.BlockSpec((tm, n_out), lambda m: (m, 0)),         # c batch tile
            pl.BlockSpec((K, 4 * n_out), lambda m: (0, 0)),      # fused weights (resident)
            pl.BlockSpec((1, 4 * n_out), lambda m: (0, 0)),      # bias (resident)
        ],
        out_specs=(
            pl.BlockSpec((tm, 4 * n_out), lambda m: (m, 0)),     # [i|f|o|c~]
            pl.BlockSpec((tm, 2 * n_out), lambda m: (m, 0)),     # [h|c]
        ),
    )

    gates, hc = pl.pallas_call(
        lstm_cell_kernel,
        out_shape=(jax.ShapeDtypeStruct((B, 4 * n_out), jnp.float32),
                   jax.ShapeDtypeStruct((B, 2 * n_out), jnp.float32)),
        grid_spec=grid_spec,
        compiler_params=pltpu.CompilerParams(
            dimension_semantics=("parallel",),
            vmem_limit_bytes=_VMEM_LIMIT,
        ),
    )(xh, c, WU, b)

    h_new = hc[:, :n_out]
    c_new = hc[:, n_out:]
    i = gates[:, 0 * n_out:1 * n_out]
    f = gates[:, 1 * n_out:2 * n_out]
    o = gates[:, 2 * n_out:3 * n_out]
    return h_new, c_new, i, f, o


# ----------------------------------------------------------------------------
# Sequence kernel: time recurrence inside the kernel, weight-stationary.
# Grid = (batch_tiles [parallel], T [arbitrary]); h/c carried in VMEM scratch.
# ----------------------------------------------------------------------------
def lstm_seq_kernel(x_ref, w_ref, u_ref, b_ref, h0_ref, c0_ref,
                    hseq_ref, hc_ref, h_scr, c_scr):
    t = pl.program_id(1)
    n_out = c0_ref.shape[-1]

    @pl.when(t == 0)
    def _():
        h_scr[...] = h0_ref[...]
        c_scr[...] = c0_ref[...]

    x = x_ref[0]                      # (tb, n_in)
    h = h_scr[...]
    c = c_scr[...]

    z = (jnp.dot(x, w_ref[...], preferred_element_type=jnp.float32)
         + jnp.dot(h, u_ref[...], preferred_element_type=jnp.float32)
         + b_ref[...])

    lane = jax.lax.broadcasted_iota(jnp.int32, z.shape, 1)
    act = jnp.where(lane >= 3 * n_out, jnp.tanh(z), jax.nn.sigmoid(z))

    i = act[:, 0 * n_out:1 * n_out]
    f = act[:, 1 * n_out:2 * n_out]
    o = act[:, 2 * n_out:3 * n_out]
    c_bar = act[:, 3 * n_out:4 * n_out]

    c_new = f * c + i * c_bar
    h_new = o * jnp.tanh(c_new)

    h_scr[...] = h_new
    c_scr[...] = c_new
    hseq_ref[0] = h_new               # per-timestep hidden output

    @pl.when(t == pl.num_programs(1) - 1)
    def _():
        hc_ref[...] = jnp.concatenate([h_new, c_new], axis=-1)


def lstm_sequence(x_seq, h0, c0, W, U, b):
    """Run the LSTM over a (T, B, n_in) sequence in one kernel launch.

    Returns (h_seq (T,B,n_out), h_T, c_T)."""
    T, B, n_in = x_seq.shape
    n_out = h0.shape[1]

    tb = B if B <= 128 else 128
    grid_b = pl.cdiv(B, tb)

    grid_spec = pltpu.PrefetchScalarGridSpec(
        num_scalar_prefetch=0,
        grid=(grid_b, T),                                          # time axis last
        in_specs=[
            pl.BlockSpec((1, tb, n_in), lambda mb, t: (t, mb, 0)),   # x_t tile
            pl.BlockSpec((n_in, 4 * n_out), lambda mb, t: (0, 0)),   # W  (resident)
            pl.BlockSpec((n_out, 4 * n_out), lambda mb, t: (0, 0)),  # U  (resident)
            pl.BlockSpec((1, 4 * n_out), lambda mb, t: (0, 0)),      # b  (resident)
            pl.BlockSpec((tb, n_out), lambda mb, t: (mb, 0)),        # h0 tile
            pl.BlockSpec((tb, n_out), lambda mb, t: (mb, 0)),        # c0 tile
        ],
        out_specs=(
            pl.BlockSpec((1, tb, n_out), lambda mb, t: (t, mb, 0)),  # h per step
            pl.BlockSpec((tb, 2 * n_out), lambda mb, t: (mb, 0)),    # final [h|c]
        ),
        scratch_shapes=[pltpu.VMEM((tb, n_out), jnp.float32),        # h carry
                        pltpu.VMEM((tb, n_out), jnp.float32)],       # c carry
    )

    h_seq, hc = pl.pallas_call(
        lstm_seq_kernel,
        out_shape=(jax.ShapeDtypeStruct((T, B, n_out), jnp.float32),
                   jax.ShapeDtypeStruct((B, 2 * n_out), jnp.float32)),
        grid_spec=grid_spec,
        compiler_params=pltpu.CompilerParams(
            dimension_semantics=("parallel", "arbitrary"),
            vmem_limit_bytes=_VMEM_LIMIT,
        ),
    )(x_seq, W, U, b, h0, c0)

    return h_seq, hc[:, :n_out], hc[:, n_out:]


# ----------------------------------------------------------------------------
# Parameter init (mimics nn.Linear U(-1/sqrt(fan_in), 1/sqrt(fan_in))) + references.
# ----------------------------------------------------------------------------
def init_params(key, n_in, n_out):
    ks = jax.random.split(key, 16)
    kW = 1.0 / jnp.sqrt(jnp.float32(n_in))
    kU = 1.0 / jnp.sqrt(jnp.float32(n_out))
    # gate order: i, f, o, c~
    W_gates = [jax.random.uniform(ks[g], (n_in, n_out), jnp.float32, -kW, kW)
               for g in range(4)]
    bW_gates = [jax.random.uniform(ks[4 + g], (n_out,), jnp.float32, -kW, kW)
                for g in range(4)]
    U_gates = [jax.random.uniform(ks[8 + g], (n_out, n_out), jnp.float32, -kU, kU)
               for g in range(4)]
    bU_gates = [jax.random.uniform(ks[12 + g], (n_out,), jnp.float32, -kU, kU)
                for g in range(4)]
    W = jnp.concatenate(W_gates, axis=1)                       # (n_in, 4*n_out)
    U = jnp.concatenate(U_gates, axis=1)                       # (n_out, 4*n_out)
    b = (jnp.concatenate(bW_gates) + jnp.concatenate(bU_gates))[None, :]
    return W, U, b


def lstm_ref(x, h, c, W, U, b):
    n_out = h.shape[1]
    z = x @ W + h @ U + b
    i = jax.nn.sigmoid(z[:, 0 * n_out:1 * n_out])
    f = jax.nn.sigmoid(z[:, 1 * n_out:2 * n_out])
    o = jax.nn.sigmoid(z[:, 2 * n_out:3 * n_out])
    c_bar = jnp.tanh(z[:, 3 * n_out:4 * n_out])
    c_new = f * c + i * c_bar
    h_new = o * jnp.tanh(c_new)
    return h_new, c_new, i, f, o


def lstm_seq_ref(x_seq, h0, c0, W, U, b):
    def step(carry, x):
        h, c = carry
        h, c, *_ = lstm_ref(x, h, c, W, U, b)
        return (h, c), h
    (hT, cT), h_seq = jax.lax.scan(step, (h0, c0), x_seq)
    return h_seq, hT, cT


if __name__ == "__main__":
    B, n_in, n_out, T = 8, 16, 32, 12
    key = jax.random.PRNGKey(0)
    kx, kh, kc, kp, ks = jax.random.split(key, 5)

    x = jax.random.normal(kx, (B, n_in), jnp.float32)
    h0 = jax.random.normal(kh, (B, n_out), jnp.float32)
    c0 = jax.random.normal(kc, (B, n_out), jnp.float32)
    x_seq = jax.random.normal(ks, (T, B, n_in), jnp.float32)
    W, U, b = init_params(kp, n_in, n_out)
    WU = jnp.concatenate([W, U], axis=0)            # (n_in + n_out, 4*n_out)

    # --- single step (module.forward semantics) ---
    h1, c1, i, f, o = lstm_cell(x, h0, c0, WU, b)
    jax.block_until_ready((h1, c1, i, f, o))
    refs = lstm_ref(x, h0, c0, W, U, b)
    for got, ref in zip((h1, c1, i, f, o), refs):
        assert jnp.allclose(got, ref, atol=1e-5, rtol=1e-5)

    # --- full sequence, time loop inside the kernel ---
    h_seq, hT, cT = lstm_sequence(x_seq, h0, c0, W, U, b)
    jax.block_until_ready((h_seq, hT, cT))
    h_seq_r, hT_r, cT_r = lstm_seq_ref(x_seq, h0, c0, W, U, b)
    assert jnp.allclose(h_seq, h_seq_r, atol=1e-4, rtol=1e-4)
    assert jnp.allclose(hT, hT_r, atol=1e-4, rtol=1e-4)
    assert jnp.allclose(cT, cT_r, atol=1e-4, rtol=1e-4)

    print("KERNEL_OK")
</pallas_src>

<mosaic_0001>
module attributes {stable_mosaic.version = 11 : i64} {
  func.func @lstm_cell_kernel(%arg0: i32, %arg1: memref<8x48xf32, #tpu.memory_space<vmem>>, %arg2: memref<8x32xf32, #tpu.memory_space<vmem>>, %arg3: memref<48x128xf32, #tpu.memory_space<vmem>>, %arg4: memref<1x128xf32, #tpu.memory_space<vmem>>, %arg5: memref<8x128xf32, #tpu.memory_space<vmem>>, %arg6: memref<8x64xf32, #tpu.memory_space<vmem>>) attributes {dimension_semantics = [#tpu.dimension_semantics<parallel>], iteration_bounds = array<i64: 1>, scalar_prefetch = 0 : i64, scratch_operands = 0 : i64, tpu.core_type = #tpu.core_type<tc>, window_params = [{transform_indices = @transform_0, window_bounds = array<i64: 8, 48>}, {transform_indices = @transform_1, window_bounds = array<i64: 8, 32>}, {pipeline_mode = #tpu.pipeline_mode<synchronous>, transform_indices = @transform_2, window_bounds = array<i64: 48, 128>}, {pipeline_mode = #tpu.pipeline_mode<synchronous>, transform_indices = @transform_3, window_bounds = array<i64: 1, 128>}, {transform_indices = @transform_4, window_bounds = array<i64: 8, 128>}, {transform_indices = @transform_5, window_bounds = array<i64: 8, 64>}]} {
    %c0 = arith.constant 0 : index
    %c0_0 = arith.constant 0 : index
    %0 = vector.load %arg1[%c0, %c0_0] : memref<8x48xf32, #tpu.memory_space<vmem>>, vector<8x48xf32>
    %c0_1 = arith.constant 0 : index
    %c0_2 = arith.constant 0 : index
    %1 = vector.load %arg3[%c0_1, %c0_2] : memref<48x128xf32, #tpu.memory_space<vmem>>, vector<48x128xf32>
    %cst = arith.constant dense<0.000000e+00> : vector<8x128xf32>
    %2 = tpu.matmul %0, %1, %cst {dimension_numbers = #tpu.dot_dimension_numbers<[1], [0], [0], [1], [0, 0, 1, 1], [], []>} : vector<8x48xf32>, vector<48x128xf32>, vector<8x128xf32> -> vector<8x128xf32>
    %c0_3 = arith.constant 0 : index
    %c0_4 = arith.constant 0 : index
    %3 = vector.load %arg4[%c0_3, %c0_4] : memref<1x128xf32, #tpu.memory_space<vmem>>, vector<1x128xf32>
    %4 = vector.broadcast %3 : vector<1x128xf32> to vector<8x128xf32>
    %5 = arith.addf %2, %4 : vector<8x128xf32>
    %6 = tpu.iota {dimensions = array<i32: 1>} : vector<8x128xi32>
    %c96_i32 = arith.constant 96 : i32
    %7 = vector.broadcast %c96_i32 : i32 to vector<8x128xi32>
    %8 = arith.cmpi sge, %6, %7 : vector<8x128xi32>
    %9 = math.tanh %5 : vector<8x128xf32>
    %10 = arith.negf %5 : vector<8x128xf32>
    %11 = math.exp %10 : vector<8x128xf32>
    %cst_5 = arith.constant 1.000000e+00 : f32
    %12 = vector.broadcast %cst_5 : f32 to vector<8x128xf32>
    %13 = arith.addf %12, %11 : vector<8x128xf32>
    %14 = arith.divf %12, %13 : vector<8x128xf32>
    %15 = arith.select %8, %9, %14 : vector<8x128xi1>, vector<8x128xf32>
    %c0_6 = arith.constant 0 : index
    %c0_7 = arith.constant 0 : index
    %16 = vector.load %arg5[%c0_6, %c0_7] : memref<8x128xf32, #tpu.memory_space<vmem>>, vector<8x128xf32>
    tpu.vector_store %arg5[%c0_6, %c0_7], %15 {strides = array<i32>} : memref<8x128xf32, #tpu.memory_space<vmem>>, vector<8x128xf32>,
    %17 = vector.extract_strided_slice %15 {offsets = [0, 0], sizes = [8, 32], strides = [1, 1]} : vector<8x128xf32> to vector<8x32xf32>
    %18 = vector.extract_strided_slice %15 {offsets = [0, 32], sizes = [8, 32], strides = [1, 1]} : vector<8x128xf32> to vector<8x32xf32>
    %19 = vector.extract_strided_slice %15 {offsets = [0, 64], sizes = [8, 32], strides = [1, 1]} : vector<8x128xf32> to vector<8x32xf32>
    %20 = vector.extract_strided_slice %15 {offsets = [0, 96], sizes = [8, 32], strides = [1, 1]} : vector<8x128xf32> to vector<8x32xf32>
    %c0_8 = arith.constant 0 : index
    %c0_9 = arith.constant 0 : index
    %21 = vector.load %arg2[%c0_8, %c0_9] : memref<8x32xf32, #tpu.memory_space<vmem>>, vector<8x32xf32>
    %22 = arith.mulf %18, %21 : vector<8x32xf32>
    %23 = arith.mulf %17, %20 : vector<8x32xf32>
    %24 = arith.addf %22, %23 : vector<8x32xf32>
    %25 = math.tanh %24 : vector<8x32xf32>
    %26 = arith.mulf %19, %25 : vector<8x32xf32>
    %27 = tpu.concatenate %26, %24 in 1 : vector<8x32xf32>, vector<8x32xf32> -> vector<8x64xf32>
    %c0_10 = arith.constant 0 : index
    %c0_11 = arith.constant 0 : index
    %28 = vector.load %arg6[%c0_10, %c0_11] : memref<8x64xf32, #tpu.memory_space<vmem>>, vector<8x64xf32>
    tpu.vector_store %arg6[%c0_10, %c0_11], %27 {strides = array<i32>} : memref<8x64xf32, #tpu.memory_space<vmem>>, vector<8x64xf32>,
    return
  }
  func.func @transform_0(%arg0: i32) -> (i32, i32) {
    %c0_i32 = arith.constant 0 : i32
    %c0_i32_0 = arith.constant 0 : i32
    return %arg0, %c0_i32 : i32, i32
  }
  func.func @transform_1(%arg0: i32) -> (i32, i32) {
    %c0_i32 = arith.constant 0 : i32
    %c0_i32_0 = arith.constant 0 : i32
    return %arg0, %c0_i32 : i32, i32
  }
  func.func @transform_2(%arg0: i32) -> (i32, i32) {
    %c0_i32 = arith.constant 0 : i32
    %c0_i32_0 = arith.constant 0 : i32
    %c0_i32_1 = arith.constant 0 : i32
    return %c0_i32, %c0_i32_0 : i32, i32
  }
  func.func @transform_3(%arg0: i32) -> (i32, i32) {
    %c0_i32 = arith.constant 0 : i32
    %c0_i32_0 = arith.constant 0 : i32
    %c0_i32_1 = arith.constant 0 : i32
    return %c0_i32, %c0_i32_0 : i32, i32
  }
  func.func @transform_4(%arg0: i32) -> (i32, i32) {
    %c0_i32 = arith.constant 0 : i32
    %c0_i32_0 = arith.constant 0 : i32
    return %arg0, %c0_i32 : i32, i32
  }
  func.func @transform_5(%arg0: i32) -> (i32, i32) {
    %c0_i32 = arith.constant 0 : i32
    %c0_i32_0 = arith.constant 0 : i32
    return %arg0, %c0_i32 : i32, i32
  }
}

</mosaic_0001>

<bundles_post_ra>
// kernel: tpu_custom_call.1
= control target key start
LH: loop header
LB: loop body
LE: loop exit
PB: predicated region body
PF: predicated region fallthrough
CT: control target
= control target key end

     0   :  { %11 = vsyncpa [#allocation3], 0  ;;  %s393_s0 = inlined_call_operand.hbm [shape: f32[8,48], index: 0, kind: input, shape index: {}]   ;;  %s394_s1 = inlined_call_operand.hbm [shape: f32[8,32], index: 1, kind: input, shape index: {}]   ;;  %s395_s2 = inlined_call_operand.hbm [shape: f32[48,128], index: 2, kind: input, shape index: {}]   ;;  %s396_s3 = inlined_call_operand.vmem [shape: f32[1,128], index: 3, kind: input, shape index: {}]   ;;  %s397_s4 = inlined_call_operand.hbm [shape: f32[8,128], index: 4, kind: output, shape index: {0}]   ;;  %s398_s5 = inlined_call_operand.hbm [shape: f32[8,64], index: 5, kind: output, shape index: {1}]  }
   0x1   :  { %12 = vsyncpa [#allocation6], 0 }
   0x2   :  { %13 = vsyncpa [#allocation4], 0  ;;  %s31_s20 = sshll.u32 %s394_s1, 4  ;;  %s32_s20 = int_to_ptr.hbm [resolvable:$true] %s31_s20 }
   0x3   :  { %14 = vsyncpa [#allocation10], 0  ;;  %s336_s21 = smov [#allocation5]   ;;  %s20_s25 = sshll.u32 %s393_s0, 4  ;;  %s21_s25 = int_to_ptr.hbm [resolvable:$true] %s20_s25 }
   0x4   :  { %s33_s22 = sshll.u32 %s336_s21, 4  ;;  %s337_s26 = smov [#allocation2]   ;;  %s34_s22 = int_to_ptr.vmem [resolvable:$true] %s33_s22 }
   0x5   :  { %36 = dma.hbm_to_vmem [thread:$0]  %s32_s20, 128, %s34_s22, [#allocation6]  }
   0x6   :  { %s22_s27 = sshll.u32 %s337_s26, 4  ;;  %s41_s30 = sshll.u32 %s395_s2, 4  ;;  %s23_s27 = int_to_ptr.vmem [resolvable:$true] %s22_s27  ;;  %s42_s30 = int_to_ptr.hbm [resolvable:$true] %s41_s30 }
   0x7   :  { %25 = dma.hbm_to_vmem [thread:$0]  %s21_s25, 128, %s23_s27, [#allocation3]  }
   0x8   :  { %s338_s1 = smov [#allocation7]   ;;  %s339_s7 = smov 128  }
   0x9   :  { %s43_s6 = sshll.u32 %s338_s1, 4  ;;  %s340_s8 = smov 8   ;;  %s44_s6 = int_to_ptr.vmem [resolvable:$true] %s43_s6 }
   0xa   :  { %49 = dma.hbm_to_vmem [thread:$0]  %s42_s30, 768, %s44_s6, [#allocation6], %s339_s7, %s339_s7, %s340_s8  }
   0xb   :  { %328 = dma.done.wait [#allocation3], 128  }
   0xc   :  { %329 = vsyncadd [#allocation3], 4294967168 }
   0xd   :  { %330 = dma.done.wait [#allocation6], 896  }
   0xe   :  { %331 = vsyncadd [#allocation6], 4294966400  ;;  %v70_v0 = vld [vmem:[#allocation7 + $0x28] sm:$0xff]  ;;  %v69_v1 = vld [vmem:[#allocation7 + $0x20] sm:$0xff]  ;;  %vm75_vm0 = vcmask 392192   ;;  %v99_v14 = vlaneseq  ;;  %s342_s9 = smov [#allocation8]  }
   0xf   :  { %89 = vmatpush.msra.mxu0 %v70_v0  ;;  %v68_v2 = vld [vmem:[#allocation7 + $0x18] sm:$0xff]  ;;  %v67_v3 = vld [vmem:[#allocation7 + $0x10] sm:$0xff]  ;;  %v66_v4 = vld [vmem:[#allocation7 + $0x8] sm:$0xff]  ;;  %s159_s10 = sshll.u32 %s342_s9, 4  ;;  %s161_s13 = sshll.u32 %s397_s4, 4  ;;  %vm150_vm6 = vcmask 261120   ;;  %s160_s10 = int_to_ptr.vmem [resolvable:$true] %s159_s10  ;;  %s162_s13 = int_to_ptr.hbm [resolvable:$true] %s161_s13 }
  0x10   :  { %v65_v5 = vld [vmem:[#allocation7] sm:$0xff]  ;;  %v64_v6 = vld [vmem:[#allocation2] sm:$0xff]  ;;  %v100_v17 = vand.u32 127, %v99_v14  ;;  %v124_v27 = vld [vmem:[#allocation5] sm:$0xff]  ;;  %s343_s14 = smov 64   ;;  %s344_s15 = smov [#allocation9]  }
  0x11   :  { %90 = vmatpush.msra.mxu0 %v69_v1  ;;  %v199_v7 = vld [vmem:[%s396_s3] ss:$0 sm:$0xff]  ;;  %s341_s3 = smov 32   ;;  %s170_s16 = sshll.u32 %s344_s15, 4  ;;  %vm152_vm7 = vcmask 523264   ;;  %s171_s16 = int_to_ptr.vmem [resolvable:$true] %s170_s16 }
  0x12   :  { %vm101_vm3 = vcmp.ge.s32.totalorder %v100_v17, 96  ;;  %s172_s19 = sshll.u32 %s398_s5, 4  ;;  %s173_s19 = int_to_ptr.hbm [resolvable:$true] %s172_s19 }
  0x13   :  { %91 = vmatpush.msra.mxu0 %v68_v2 }
  0x15   :  { %92 = vmatpush.msra.mxu0 %v67_v3 }
  0x17   :  { %93 = vmatpush.msra.mxu0 %v66_v4 }
  0x19   :  { %94 = vmatpush.msra.mxu0 %v65_v5 }
  0x1a   :  { %188 = vmatmul.msk.f32.vlgmr.msra.gmra.mxu0 %vm75_vm0, %v64_v6 }
  0x97   :  { %v96_v8 = vpop.f32.mrf.mxu0 }
  0x98   :  { %v97_v9 = vadd.f32 %v199_v7, %v96_v8 }
  0x9a   :  { %v189_v10 = vmul.f32 -1.442695, %v97_v9 }
  0x9c   :  { %200 = vpow2.f32 %v189_v10 }
  0xa2   :  { %v201_v11 = vpop.eup %200 }
  0xa3   :  { %v106_v12 = vadd.f32 1.0, %v201_v11 }
  0xa5   :  { %202 = vrcp.f32 %v106_v12  ;;  %v118_v18 = vand.u32 2147483648, %v106_v12  ;;  %v116_v20 = vand.u32 2147483647, %v106_v12  ;;  %vm112_vm2 = vweird.f32 %v106_v12 }
  0xa6   :  { %204 = vtanh.f32 %v97_v9 }
  0xa7   :  { %v119_v22 = vor.u32 1.1754944e-38, %v118_v18  ;;  %vm117_vm5 = vcmp.eq.f32.partialorder %v116_v20, 8.507059e+37 }
  0xab   :  { %v203_v13 = vpop.eup %202 }
  0xac   :  { %v108_v15 = vmul.f32 %v203_v13, %v106_v12  ;;  %vm113_vm1 = vweird.f32 %v203_v13  ;;  %v205_v24 = vpop.eup %204 }
  0xad   :  { %vm114_vm4 = vmor %vm112_vm2, %vm113_vm1 }
  0xae   :  { %v109_v16 = vsub.f32 1.0, %v108_v15 }
  0xb0   :  { %v110_v19 = vmul.f32 %v203_v13, %v109_v16 }
  0xb2   :  { %v111_v21 = vadd.f32 %v203_v13, %v110_v19 }
  0xb4   :  { %v115_v23 = vsel %vm114_vm4, %v203_v13, %v111_v21 }
  0xb5   :  { %v120_v25 = vsel %vm117_vm5, %v119_v22, %v115_v23 }
  0xb6   :  { %v122_v26 = vsel %vm101_vm3, %v205_v24, %v120_v25 }
  0xb7   :  { %131 = vrot.lane.b32.xlu0 %v122_v26, %s341_s3  ;;  %123 = vst [vmem:[#allocation8] sm:$0xff] %v122_v26 }
  0xb8   :  { %164 = dma.vmem_to_hbm [thread:$0]  %s160_s10, 128, %s162_s13, [#allocation4]  }
  0xbf   :  { %126 = vrot.lane.b32.xlu0 %v124_v27, %s341_s3 }
 0x129   :  { %v132_v28 = vpop.permute.xlu0 %131 }
 0x12a   :  { %v134_v29 = vmul.f32 %v132_v28, %v122_v26 }
 0x12c   :  { %136 = vrot.lane.b32.xlu1 %v134_v29, %s341_s3 }
 0x131   :  { %v127_v30 = vpop.permute.xlu0 %126 }
 0x132   :  { %v129_v31 = vmul.f32 %v127_v30, %v122_v26 }
 0x19e   :  { %v137_v32 = vpop.permute.xlu1 %136 }
 0x19f   :  { %v139_v33 = vadd.f32 %v137_v32, %v129_v31 }
 0x1a1   :  { %206 = vtanh.f32 %v139_v33 }
 0x1a7   :  { %v207_v34 = vpop.eup %206 }
 0x1a8   :  { %142 = vrot.lane.b32.xlu1 %v207_v34, %s341_s3 }
 0x21a   :  { %v143_v35 = vpop.permute.xlu1 %142 }
 0x21b   :  { %v145_v36 = vmul.f32 %v143_v35, %v122_v26 }
 0x21d   :  { %147 = vrot.lane.b32.xlu2 %v145_v36, %s343_s14 }
 0x277   :  { %v148_v37 = vpop.permute.xlu2 %147 }
 0x278   :  { %v151_v38 = vsel %vm150_vm6, %v148_v37, %v139_v33 }
 0x279   :  { %153 = vst.msk [vmem:[#allocation9] sm:$0xff] %vm152_vm7, %v151_v38 }
 0x27a   :  { %175 = dma.vmem_to_hbm [thread:$0]  %s171_s16, 128, %s173_s19, [#allocation10]  }
 0x27b   :  { %332 = dma.done.wait [#allocation4], 128  }
 0x27c   :  { %333 = vsyncadd [#allocation4], 4294967168 }
 0x27d   :  { %334 = dma.done.wait [#allocation10], 128  }
 0x27e   :  { %335 = vsyncadd [#allocation10], 4294967168 }
 0x27f   :  { %184 = vsyncpa [#allocation3], 1 }
 0x280   :  { %185 = vsyncpa [#allocation6], 1 }
 0x281   :  { %186 = vsyncpa [#allocation4], 1 }
 0x282   :  { %187 = vsyncpa [#allocation10], 1 }

</bundles_post_ra>
